<compile_context>
chip_gen: v7x
topology: tpu7x:2x2x1
jax: 0.10.0
libtpu: 0.0.40
codegen_flags: <defaults>
</compile_context>

<pallas_src>
import functools

import jax
import jax.numpy as jnp
from jax.experimental import pallas as pl
from jax.experimental.pallas import tpu as pltpu


def _round_up(v, m):
    return ((v + m - 1) // m) * m


def _pick_mode_tile(m_pad, bytes_per_mode, vmem_budget):
    """Largest mode tile (multiple of 128 dividing m_pad) whose double-buffered
    working set fits the VMEM budget; prefer >=2 grid steps so both v7x
    TensorCores get work."""
    best = 128
    mt = 128
    while mt <= m_pad:
        if m_pad % mt == 0 and 2 * mt * bytes_per_mode <= vmem_budget:
            best = mt
        mt += 128
    if best == m_pad and m_pad >= 256 and (m_pad // 2) % 128 == 0:
        best = m_pad // 2           # split so both TensorCores get a block
    return best


def _spectral_mix_kernel(xr_ref, xi_ref, cr_ref, ci_ref, pj_ref, or_ref, oi_ref):
    """Low-rank spectral mixing of one lane-dense mode tile.

    Block shapes (per grid step over mode tiles):
      xr_ref / xi_ref : (Cin, B,  Mt)    real / imag of x_ft
      cr_ref / ci_ref : (Cin, Rp, Mt)    real / imag of low-rank coefficients
      pj_ref          : (Cout_p, Rp)     real projection matrix (resident)
      or_ref / oi_ref : (B, Cout_p, Mt)  real / imag of the mixed modes
    """
    c_in, b_sz, mt = xr_ref.shape
    rp = cr_ref.shape[1]

    # ---- rank contraction on the VPU, accumulating over Cin ---------------
    # Only the (B, Rp, Mt) accumulators stay live.  Cin is a compile-time
    # constant, so the loop fully unrolls with static leading-dim indices
    # (free tile selects, no dynamic sublane slicing).
    tre = jnp.zeros((b_sz, rp, mt), jnp.float32)
    tim = jnp.zeros((b_sz, rp, mt), jnp.float32)
    for i in range(c_in):
        xr_i = xr_ref[i]            # (B, Mt)
        xi_i = xi_ref[i]
        cr_i = cr_ref[i]            # (Rp, Mt)
        ci_i = ci_ref[i]
        tre = tre + xr_i[:, None, :] * cr_i[None, :, :] \
                  - xi_i[:, None, :] * ci_i[None, :, :]
        tim = tim + xr_i[:, None, :] * ci_i[None, :, :] \
                  + xi_i[:, None, :] * cr_i[None, :, :]
    # TODO(synk): for very large Cin, add a grid reduction axis ("arbitrary")
    # with a VMEM scratch accumulator instead of the unrolled loop.

    # ---- real projection over rank on the MXU ------------------------------
    pj = pj_ref[...]                # (Cout_p, Rp), real
    for b in range(b_sz):           # B is static and small
        or_ref[b, :, :] = jnp.dot(pj, tre[b], preferred_element_type=jnp.float32)
        oi_ref[b, :, :] = jnp.dot(pj, tim[b], preferred_element_type=jnp.float32)


@functools.partial(jax.jit, static_argnames=("n_modes",))
def spectral_conv_nd_forward(x, coeff_real, coeff_imag, proj, n_modes):
    """JAX/Pallas equivalent of SpectralConvND.forward (1D and 2D)."""
    n_dims = len(n_modes)
    assert n_dims in (1, 2), "only 1D / 2D spectral conv is implemented"
    B, c_in = x.shape[0], x.shape[1]
    spatial = x.shape[2:]
    out_ch, rank = proj.shape

    fft_axes = tuple(range(-n_dims, 0))
    x_ft = jnp.fft.rfftn(x.astype(jnp.float32), axes=fft_axes)   # complex64

    # Slice available modes, reorganize coeff to (Cin, R, M) so a per-input-
    # channel slice is a natural (R, Mt) tile inside the kernel.
    if n_dims == 1:
        m0 = min(n_modes[0], x_ft.shape[-1])
        modes = (m0,)
        x_slice = x_ft[..., :m0]
        c_r = jnp.transpose(coeff_real[:, :m0, :], (2, 0, 1))
        c_i = jnp.transpose(coeff_imag[:, :m0, :], (2, 0, 1))
    else:
        mx = min(n_modes[0], x_ft.shape[-2])
        my = min(n_modes[1], x_ft.shape[-1])
        modes = (mx, my)
        x_slice = x_ft[..., :mx, :my]
        c_r = jnp.transpose(coeff_real[:, :mx, :my, :], (3, 0, 1, 2))
        c_i = jnp.transpose(coeff_imag[:, :mx, :my, :], (3, 0, 1, 2))

    M = 1
    for m in modes:
        M *= m
    Mp = _round_up(M, 128)              # lane-dense mode axis
    Rp = _round_up(rank, 8)             # sublane-aligned rank (zero padded)
    Cout_p = _round_up(out_ch, 8)       # sublane-aligned output channels

    c_r = c_r.reshape(c_in, rank, M).astype(jnp.float32)
    c_i = c_i.reshape(c_in, rank, M).astype(jnp.float32)

    # x_ft real/imag, layout (Cin, B, M): per-input-channel slices become
    # natural (B, Mt) tiles (leading-dim indexing is free in the kernel).
    perm = (1, 0) + tuple(range(2, 2 + n_dims))
    xr = jnp.transpose(jnp.real(x_slice), perm).reshape(c_in, B, M).astype(jnp.float32)
    xi = jnp.transpose(jnp.imag(x_slice), perm).reshape(c_in, B, M).astype(jnp.float32)

    pad_m = Mp - M
    if pad_m:
        xr = jnp.pad(xr, ((0, 0), (0, 0), (0, pad_m)))
        xi = jnp.pad(xi, ((0, 0), (0, 0), (0, pad_m)))
        c_r = jnp.pad(c_r, ((0, 0), (0, 0), (0, pad_m)))
        c_i = jnp.pad(c_i, ((0, 0), (0, 0), (0, pad_m)))
    if Rp != rank:
        c_r = jnp.pad(c_r, ((0, 0), (0, Rp - rank), (0, 0)))
        c_i = jnp.pad(c_i, ((0, 0), (0, Rp - rank), (0, 0)))
    proj_p = proj.astype(jnp.float32)
    if Cout_p != out_ch or Rp != rank:
        proj_p = jnp.pad(proj_p, ((0, Cout_p - out_ch), (0, Rp - rank)))
    # TODO(synk): stream xr/xi and c_r/c_i as bfloat16 (f32 accumulate) on
    # v6e/v7x only -- keep f32 on v5e (no bf16 VALU) -- and re-validate.

    # VMEM-budgeted mode tiling (double-buffered streams + both outputs).
    bytes_per_mode = 4 * (2 * c_in * B + 2 * c_in * Rp + 2 * B * Cout_p)
    vmem_budget = 12 * 1024 * 1024
    Mt = _pick_mode_tile(Mp, bytes_per_mode, vmem_budget)
    grid = (Mp // Mt,)

    x_spec = pl.BlockSpec((c_in, B, Mt), lambda j: (0, 0, j))
    c_spec = pl.BlockSpec((c_in, Rp, Mt), lambda j: (0, 0, j))
    p_spec = pl.BlockSpec((Cout_p, Rp), lambda j: (0, 0))
    o_spec = pl.BlockSpec((B, Cout_p, Mt), lambda j: (0, 0, j))

    flops = Mp * (8 * B * Rp * c_in + 4 * B * Cout_p * Rp)
    bytes_accessed = 4 * (2 * c_in * B * Mp + 2 * c_in * Rp * Mp
                          + 2 * B * Cout_p * Mp + Cout_p * Rp)
    cost = pl.CostEstimate(flops=flops, transcendentals=0,
                           bytes_accessed=bytes_accessed)

    out_r, out_i = pl.pallas_call(
        _spectral_mix_kernel,
        out_shape=(
            jax.ShapeDtypeStruct((B, Cout_p, Mp), jnp.float32),
            jax.ShapeDtypeStruct((B, Cout_p, Mp), jnp.float32),
        ),
        grid=grid,
        in_specs=[x_spec, x_spec, c_spec, c_spec, p_spec],
        out_specs=(o_spec, o_spec),
        compiler_params=pltpu.CompilerParams(
            dimension_semantics=("parallel",),
            vmem_limit_bytes=32 * 1024 * 1024),
        cost_estimate=cost,
    )(xr, xi, c_r, c_i, proj_p)

    # Drop channel / mode padding, zero-pad up to the full spectrum with a
    # single fused pad (no zeros + scatter round trip), and invert.
    mixed_r = out_r[:, :out_ch, :M].reshape((B, out_ch) + modes)
    mixed_i = out_i[:, :out_ch, :M].reshape((B, out_ch) + modes)
    mixed = jax.lax.complex(mixed_r, mixed_i)
    freq_shape = x_ft.shape[2:]
    pad_cfg = ((0, 0), (0, 0)) + tuple((0, f - m) for f, m in zip(freq_shape, modes))
    out_ft = jnp.pad(mixed, pad_cfg)
    return jnp.fft.irfftn(out_ft, s=spatial, axes=fft_axes)


def _reference_forward(x, coeff_real, coeff_imag, proj, n_modes):
    """Pure-JAX reference mirroring the PyTorch module exactly (2D case)."""
    B, c_in, H, W = x.shape
    out_ch = proj.shape[0]
    x_ft = jnp.fft.rfftn(x.astype(jnp.float32), axes=(-2, -1))
    mx = min(n_modes[0], x_ft.shape[-2])
    my = min(n_modes[1], x_ft.shape[-1])
    coeff_c = (coeff_real + 1j * coeff_imag).astype(jnp.complex64)
    Wc = jnp.einsum("or,rmni->oimn", proj.astype(jnp.complex64), coeff_c)
    out_ft = jnp.zeros((B, out_ch, H, W // 2 + 1), dtype=jnp.complex64)
    mixed = jnp.einsum("bimn,oimn->bomn", x_ft[..., :mx, :my], Wc[:, :, :mx, :my])
    out_ft = out_ft.at[..., :mx, :my].set(mixed)
    return jnp.fft.irfftn(out_ft, s=(H, W), axes=(-2, -1))


if __name__ == "__main__":
    # Small shapes consistent with the module: batch=2, in_ch=4, out_ch=4,
    # spatial 16x16, n_modes=(8, 8), rank = min(in_ch, out_ch) = 4.
    B, in_ch, out_ch = 2, 4, 4
    H, W = 16, 16
    n_modes = (8, 8)
    rank = min(in_ch, out_ch)

    key = jax.random.PRNGKey(0)
    k_x, k_cr, k_ci, k_p = jax.random.split(key, 4)
    x = jax.random.normal(k_x, (B, in_ch, H, W), dtype=jnp.float32)
    coeff_real = jax.random.normal(k_cr, (rank, n_modes[0], n_modes[1], in_ch), dtype=jnp.float32)
    coeff_imag = jax.random.normal(k_ci, (rank, n_modes[0], n_modes[1], in_ch), dtype=jnp.float32)
    proj = jax.random.normal(k_p, (out_ch, rank), dtype=jnp.float32)

    out = spectral_conv_nd_forward(x, coeff_real, coeff_imag, proj, n_modes)
    out = jax.block_until_ready(out)

    ref = jax.block_until_ready(_reference_forward(x, coeff_real, coeff_imag, proj, n_modes))
    assert out.shape == (B, out_ch, H, W), out.shape
    assert jnp.allclose(out, ref, rtol=2e-3, atol=2e-3), float(jnp.max(jnp.abs(out - ref)))

    print("KERNEL_OK")
</pallas_src>

<mosaic_0001>
module attributes {stable_mosaic.version = 11 : i64} {
  func.func @_spectral_mix_kernel(%arg0: i32, %arg1: memref<4x2x128xf32, #tpu.memory_space<vmem>>, %arg2: memref<4x2x128xf32, #tpu.memory_space<vmem>>, %arg3: memref<4x8x128xf32, #tpu.memory_space<vmem>>, %arg4: memref<4x8x128xf32, #tpu.memory_space<vmem>>, %arg5: memref<8x8xf32, #tpu.memory_space<vmem>>, %arg6: memref<2x8x128xf32, #tpu.memory_space<vmem>>, %arg7: memref<2x8x128xf32, #tpu.memory_space<vmem>>) attributes {dimension_semantics = [#tpu.dimension_semantics<parallel>], iteration_bounds = array<i64: 1>, scalar_prefetch = 0 : i64, scratch_operands = 0 : i64, tpu.core_type = #tpu.core_type<tc>, window_params = [{transform_indices = @transform_0, window_bounds = array<i64: 4, 2, 128>}, {transform_indices = @transform_1, window_bounds = array<i64: 4, 2, 128>}, {transform_indices = @transform_2, window_bounds = array<i64: 4, 8, 128>}, {transform_indices = @transform_3, window_bounds = array<i64: 4, 8, 128>}, {pipeline_mode = #tpu.pipeline_mode<synchronous>, transform_indices = @transform_4, window_bounds = array<i64: 8, 8>}, {transform_indices = @transform_5, window_bounds = array<i64: 2, 8, 128>}, {transform_indices = @transform_6, window_bounds = array<i64: 2, 8, 128>}]} {
    %cst = arith.constant 0.000000e+00 : f32
    %0 = vector.broadcast %cst : f32 to vector<2x8x128xf32>
    %cst_0 = arith.constant 0.000000e+00 : f32
    %1 = vector.broadcast %cst_0 : f32 to vector<2x8x128xf32>
    %c0 = arith.constant 0 : index
    %c0_1 = arith.constant 0 : index
    %c0_2 = arith.constant 0 : index
    %2 = vector.load %arg1[%c0, %c0_1, %c0_2] : memref<4x2x128xf32, #tpu.memory_space<vmem>>, vector<1x2x128xf32>
    %3 = vector.shape_cast %2 : vector<1x2x128xf32> to vector<2x128xf32>
    %c0_3 = arith.constant 0 : index
    %c0_4 = arith.constant 0 : index
    %c0_5 = arith.constant 0 : index
    %4 = vector.load %arg2[%c0_3, %c0_4, %c0_5] : memref<4x2x128xf32, #tpu.memory_space<vmem>>, vector<1x2x128xf32>
    %5 = vector.shape_cast %4 : vector<1x2x128xf32> to vector<2x128xf32>
    %c0_6 = arith.constant 0 : index
    %c0_7 = arith.constant 0 : index
    %c0_8 = arith.constant 0 : index
    %6 = vector.load %arg3[%c0_6, %c0_7, %c0_8] : memref<4x8x128xf32, #tpu.memory_space<vmem>>, vector<1x8x128xf32>
    %7 = vector.shape_cast %6 : vector<1x8x128xf32> to vector<8x128xf32>
    %c0_9 = arith.constant 0 : index
    %c0_10 = arith.constant 0 : index
    %c0_11 = arith.constant 0 : index
    %8 = vector.load %arg4[%c0_9, %c0_10, %c0_11] : memref<4x8x128xf32, #tpu.memory_space<vmem>>, vector<1x8x128xf32>
    %9 = vector.shape_cast %8 : vector<1x8x128xf32> to vector<8x128xf32>
    %10 = vector.shape_cast %3 : vector<2x128xf32> to vector<2x1x128xf32>
    %11 = vector.shape_cast %7 : vector<8x128xf32> to vector<1x8x128xf32>
    %12 = vector.broadcast %10 : vector<2x1x128xf32> to vector<2x8x128xf32>
    %13 = vector.broadcast %11 : vector<1x8x128xf32> to vector<2x8x128xf32>
    %14 = arith.mulf %12, %13 : vector<2x8x128xf32>
    %15 = arith.addf %0, %14 : vector<2x8x128xf32>
    %16 = vector.shape_cast %5 : vector<2x128xf32> to vector<2x1x128xf32>
    %17 = vector.shape_cast %9 : vector<8x128xf32> to vector<1x8x128xf32>
    %18 = vector.broadcast %16 : vector<2x1x128xf32> to vector<2x8x128xf32>
    %19 = vector.broadcast %17 : vector<1x8x128xf32> to vector<2x8x128xf32>
    %20 = arith.mulf %18, %19 : vector<2x8x128xf32>
    %21 = arith.subf %15, %20 : vector<2x8x128xf32>
    %22 = vector.shape_cast %3 : vector<2x128xf32> to vector<2x1x128xf32>
    %23 = vector.shape_cast %9 : vector<8x128xf32> to vector<1x8x128xf32>
    %24 = vector.broadcast %22 : vector<2x1x128xf32> to vector<2x8x128xf32>
    %25 = vector.broadcast %23 : vector<1x8x128xf32> to vector<2x8x128xf32>
    %26 = arith.mulf %24, %25 : vector<2x8x128xf32>
    %27 = arith.addf %1, %26 : vector<2x8x128xf32>
    %28 = vector.shape_cast %5 : vector<2x128xf32> to vector<2x1x128xf32>
    %29 = vector.shape_cast %7 : vector<8x128xf32> to vector<1x8x128xf32>
    %30 = vector.broadcast %28 : vector<2x1x128xf32> to vector<2x8x128xf32>
    %31 = vector.broadcast %29 : vector<1x8x128xf32> to vector<2x8x128xf32>
    %32 = arith.mulf %30, %31 : vector<2x8x128xf32>
    %33 = arith.addf %27, %32 : vector<2x8x128xf32>
    %c1 = arith.constant 1 : index
    %c0_12 = arith.constant 0 : index
    %c0_13 = arith.constant 0 : index
    %34 = vector.load %arg1[%c1, %c0_12, %c0_13] : memref<4x2x128xf32, #tpu.memory_space<vmem>>, vector<1x2x128xf32>
    %35 = vector.shape_cast %34 : vector<1x2x128xf32> to vector<2x128xf32>
    %c1_14 = arith.constant 1 : index
    %c0_15 = arith.constant 0 : index
    %c0_16 = arith.constant 0 : index
    %36 = vector.load %arg2[%c1_14, %c0_15, %c0_16] : memref<4x2x128xf32, #tpu.memory_space<vmem>>, vector<1x2x128xf32>
    %37 = vector.shape_cast %36 : vector<1x2x128xf32> to vector<2x128xf32>
    %c1_17 = arith.constant 1 : index
    %c0_18 = arith.constant 0 : index
    %c0_19 = arith.constant 0 : index
    %38 = vector.load %arg3[%c1_17, %c0_18, %c0_19] : memref<4x8x128xf32, #tpu.memory_space<vmem>>, vector<1x8x128xf32>
    %39 = vector.shape_cast %38 : vector<1x8x128xf32> to vector<8x128xf32>
    %c1_20 = arith.constant 1 : index
    %c0_21 = arith.constant 0 : index
    %c0_22 = arith.constant 0 : index
    %40 = vector.load %arg4[%c1_20, %c0_21, %c0_22] : memref<4x8x128xf32, #tpu.memory_space<vmem>>, vector<1x8x128xf32>
    %41 = vector.shape_cast %40 : vector<1x8x128xf32> to vector<8x128xf32>
    %42 = vector.shape_cast %35 : vector<2x128xf32> to vector<2x1x128xf32>
    %43 = vector.shape_cast %39 : vector<8x128xf32> to vector<1x8x128xf32>
    %44 = vector.broadcast %42 : vector<2x1x128xf32> to vector<2x8x128xf32>
    %45 = vector.broadcast %43 : vector<1x8x128xf32> to vector<2x8x128xf32>
    %46 = arith.mulf %44, %45 : vector<2x8x128xf32>
    %47 = arith.addf %21, %46 : vector<2x8x128xf32>
    %48 = vector.shape_cast %37 : vector<2x128xf32> to vector<2x1x128xf32>
    %49 = vector.shape_cast %41 : vector<8x128xf32> to vector<1x8x128xf32>
    %50 = vector.broadcast %48 : vector<2x1x128xf32> to vector<2x8x128xf32>
    %51 = vector.broadcast %49 : vector<1x8x128xf32> to vector<2x8x128xf32>
    %52 = arith.mulf %50, %51 : vector<2x8x128xf32>
    %53 = arith.subf %47, %52 : vector<2x8x128xf32>
    %54 = vector.shape_cast %35 : vector<2x128xf32> to vector<2x1x128xf32>
    %55 = vector.shape_cast %41 : vector<8x128xf32> to vector<1x8x128xf32>
    %56 = vector.broadcast %54 : vector<2x1x128xf32> to vector<2x8x128xf32>
    %57 = vector.broadcast %55 : vector<1x8x128xf32> to vector<2x8x128xf32>
    %58 = arith.mulf %56, %57 : vector<2x8x128xf32>
    %59 = arith.addf %33, %58 : vector<2x8x128xf32>
    %60 = vector.shape_cast %37 : vector<2x128xf32> to vector<2x1x128xf32>
    %61 = vector.shape_cast %39 : vector<8x128xf32> to vector<1x8x128xf32>
    %62 = vector.broadcast %60 : vector<2x1x128xf32> to vector<2x8x128xf32>
    %63 = vector.broadcast %61 : vector<1x8x128xf32> to vector<2x8x128xf32>
    %64 = arith.mulf %62, %63 : vector<2x8x128xf32>
    %65 = arith.addf %59, %64 : vector<2x8x128xf32>
    %c2 = arith.constant 2 : index
    %c0_23 = arith.constant 0 : index
    %c0_24 = arith.constant 0 : index
    %66 = vector.load %arg1[%c2, %c0_23, %c0_24] : memref<4x2x128xf32, #tpu.memory_space<vmem>>, vector<1x2x128xf32>
    %67 = vector.shape_cast %66 : vector<1x2x128xf32> to vector<2x128xf32>
    %c2_25 = arith.constant 2 : index
    %c0_26 = arith.constant 0 : index
    %c0_27 = arith.constant 0 : index
    %68 = vector.load %arg2[%c2_25, %c0_26, %c0_27] : memref<4x2x128xf32, #tpu.memory_space<vmem>>, vector<1x2x128xf32>
    %69 = vector.shape_cast %68 : vector<1x2x128xf32> to vector<2x128xf32>
    %c2_28 = arith.constant 2 : index
    %c0_29 = arith.constant 0 : index
    %c0_30 = arith.constant 0 : index
    %70 = vector.load %arg3[%c2_28, %c0_29, %c0_30] : memref<4x8x128xf32, #tpu.memory_space<vmem>>, vector<1x8x128xf32>
    %71 = vector.shape_cast %70 : vector<1x8x128xf32> to vector<8x128xf32>
    %c2_31 = arith.constant 2 : index
    %c0_32 = arith.constant 0 : index
    %c0_33 = arith.constant 0 : index
    %72 = vector.load %arg4[%c2_31, %c0_32, %c0_33] : memref<4x8x128xf32, #tpu.memory_space<vmem>>, vector<1x8x128xf32>
    %73 = vector.shape_cast %72 : vector<1x8x128xf32> to vector<8x128xf32>
    %74 = vector.shape_cast %67 : vector<2x128xf32> to vector<2x1x128xf32>
    %75 = vector.shape_cast %71 : vector<8x128xf32> to vector<1x8x128xf32>
    %76 = vector.broadcast %74 : vector<2x1x128xf32> to vector<2x8x128xf32>
    %77 = vector.broadcast %75 : vector<1x8x128xf32> to vector<2x8x128xf32>
    %78 = arith.mulf %76, %77 : vector<2x8x128xf32>
    %79 = arith.addf %53, %78 : vector<2x8x128xf32>
    %80 = vector.shape_cast %69 : vector<2x128xf32> to vector<2x1x128xf32>
    %81 = vector.shape_cast %73 : vector<8x128xf32> to vector<1x8x128xf32>
    %82 = vector.broadcast %80 : vector<2x1x128xf32> to vector<2x8x128xf32>
    %83 = vector.broadcast %81 : vector<1x8x128xf32> to vector<2x8x128xf32>
    %84 = arith.mulf %82, %83 : vector<2x8x128xf32>
    %85 = arith.subf %79, %84 : vector<2x8x128xf32>
    %86 = vector.shape_cast %67 : vector<2x128xf32> to vector<2x1x128xf32>
    %87 = vector.shape_cast %73 : vector<8x128xf32> to vector<1x8x128xf32>
    %88 = vector.broadcast %86 : vector<2x1x128xf32> to vector<2x8x128xf32>
    %89 = vector.broadcast %87 : vector<1x8x128xf32> to vector<2x8x128xf32>
    %90 = arith.mulf %88, %89 : vector<2x8x128xf32>
    %91 = arith.addf %65, %90 : vector<2x8x128xf32>
    %92 = vector.shape_cast %69 : vector<2x128xf32> to vector<2x1x128xf32>
    %93 = vector.shape_cast %71 : vector<8x128xf32> to vector<1x8x128xf32>
    %94 = vector.broadcast %92 : vector<2x1x128xf32> to vector<2x8x128xf32>
    %95 = vector.broadcast %93 : vector<1x8x128xf32> to vector<2x8x128xf32>
    %96 = arith.mulf %94, %95 : vector<2x8x128xf32>
    %97 = arith.addf %91, %96 : vector<2x8x128xf32>
    %c3 = arith.constant 3 : index
    %c0_34 = arith.constant 0 : index
    %c0_35 = arith.constant 0 : index
    %98 = vector.load %arg1[%c3, %c0_34, %c0_35] : memref<4x2x128xf32, #tpu.memory_space<vmem>>, vector<1x2x128xf32>
    %99 = vector.shape_cast %98 : vector<1x2x128xf32> to vector<2x128xf32>
    %c3_36 = arith.constant 3 : index
    %c0_37 = arith.constant 0 : index
    %c0_38 = arith.constant 0 : index
    %100 = vector.load %arg2[%c3_36, %c0_37, %c0_38] : memref<4x2x128xf32, #tpu.memory_space<vmem>>, vector<1x2x128xf32>
    %101 = vector.shape_cast %100 : vector<1x2x128xf32> to vector<2x128xf32>
    %c3_39 = arith.constant 3 : index
    %c0_40 = arith.constant 0 : index
    %c0_41 = arith.constant 0 : index
    %102 = vector.load %arg3[%c3_39, %c0_40, %c0_41] : memref<4x8x128xf32, #tpu.memory_space<vmem>>, vector<1x8x128xf32>
    %103 = vector.shape_cast %102 : vector<1x8x128xf32> to vector<8x128xf32>
    %c3_42 = arith.constant 3 : index
    %c0_43 = arith.constant 0 : index
    %c0_44 = arith.constant 0 : index
    %104 = vector.load %arg4[%c3_42, %c0_43, %c0_44] : memref<4x8x128xf32, #tpu.memory_space<vmem>>, vector<1x8x128xf32>
    %105 = vector.shape_cast %104 : vector<1x8x128xf32> to vector<8x128xf32>
    %106 = vector.shape_cast %99 : vector<2x128xf32> to vector<2x1x128xf32>
    %107 = vector.shape_cast %103 : vector<8x128xf32> to vector<1x8x128xf32>
    %108 = vector.broadcast %106 : vector<2x1x128xf32> to vector<2x8x128xf32>
    %109 = vector.broadcast %107 : vector<1x8x128xf32> to vector<2x8x128xf32>
    %110 = arith.mulf %108, %109 : vector<2x8x128xf32>
    %111 = arith.addf %85, %110 : vector<2x8x128xf32>
    %112 = vector.shape_cast %101 : vector<2x128xf32> to vector<2x1x128xf32>
    %113 = vector.shape_cast %105 : vector<8x128xf32> to vector<1x8x128xf32>
    %114 = vector.broadcast %112 : vector<2x1x128xf32> to vector<2x8x128xf32>
    %115 = vector.broadcast %113 : vector<1x8x128xf32> to vector<2x8x128xf32>
    %116 = arith.mulf %114, %115 : vector<2x8x128xf32>
    %117 = arith.subf %111, %116 : vector<2x8x128xf32>
    %118 = vector.shape_cast %99 : vector<2x128xf32> to vector<2x1x128xf32>
    %119 = vector.shape_cast %105 : vector<8x128xf32> to vector<1x8x128xf32>
    %120 = vector.broadcast %118 : vector<2x1x128xf32> to vector<2x8x128xf32>
    %121 = vector.broadcast %119 : vector<1x8x128xf32> to vector<2x8x128xf32>
    %122 = arith.mulf %120, %121 : vector<2x8x128xf32>
    %123 = arith.addf %97, %122 : vector<2x8x128xf32>
    %124 = vector.shape_cast %101 : vector<2x128xf32> to vector<2x1x128xf32>
    %125 = vector.shape_cast %103 : vector<8x128xf32> to vector<1x8x128xf32>
    %126 = vector.broadcast %124 : vector<2x1x128xf32> to vector<2x8x128xf32>
    %127 = vector.broadcast %125 : vector<1x8x128xf32> to vector<2x8x128xf32>
    %128 = arith.mulf %126, %127 : vector<2x8x128xf32>
    %129 = arith.addf %123, %128 : vector<2x8x128xf32>
    %c0_45 = arith.constant 0 : index
    %c0_46 = arith.constant 0 : index
    %130 = vector.load %arg5[%c0_45, %c0_46] : memref<8x8xf32, #tpu.memory_space<vmem>>, vector<8x8xf32>
    %131 = vector.extract_strided_slice %117 {offsets = [0, 0, 0], sizes = [1, 8, 128], strides = [1, 1, 1]} : vector<2x8x128xf32> to vector<1x8x128xf32>
    %132 = vector.shape_cast %131 : vector<1x8x128xf32> to vector<8x128xf32>
    %cst_47 = arith.constant dense<0.000000e+00> : vector<8x128xf32>
    %133 = tpu.matmul %130, %132, %cst_47 {dimension_numbers = #tpu.dot_dimension_numbers<[1], [0], [0], [1], [0, 0, 1, 1], [], []>} : vector<8x8xf32>, vector<8x128xf32>, vector<8x128xf32> -> vector<8x128xf32>
    %c0_48 = arith.constant 0 : index
    %c0_49 = arith.constant 0 : index
    %c0_50 = arith.constant 0 : index
    %134 = vector.load %arg6[%c0_48, %c0_49, %c0_50] : memref<2x8x128xf32, #tpu.memory_space<vmem>>, vector<1x8x128xf32>
    %135 = vector.shape_cast %134 : vector<1x8x128xf32> to vector<8x128xf32>
    %136 = vector.shape_cast %133 : vector<8x128xf32> to vector<1x8x128xf32>
    tpu.vector_store %arg6[%c0_48, %c0_49, %c0_50], %136 {strides = array<i32>} : memref<2x8x128xf32, #tpu.memory_space<vmem>>, vector<1x8x128xf32>,
    %137 = vector.extract_strided_slice %129 {offsets = [0, 0, 0], sizes = [1, 8, 128], strides = [1, 1, 1]} : vector<2x8x128xf32> to vector<1x8x128xf32>
    %138 = vector.shape_cast %137 : vector<1x8x128xf32> to vector<8x128xf32>
    %cst_51 = arith.constant dense<0.000000e+00> : vector<8x128xf32>
    %139 = tpu.matmul %130, %138, %cst_51 {dimension_numbers = #tpu.dot_dimension_numbers<[1], [0], [0], [1], [0, 0, 1, 1], [], []>} : vector<8x8xf32>, vector<8x128xf32>, vector<8x128xf32> -> vector<8x128xf32>
    %c0_52 = arith.constant 0 : index
    %c0_53 = arith.constant 0 : index
    %c0_54 = arith.constant 0 : index
    %140 = vector.load %arg7[%c0_52, %c0_53, %c0_54] : memref<2x8x128xf32, #tpu.memory_space<vmem>>, vector<1x8x128xf32>
    %141 = vector.shape_cast %140 : vector<1x8x128xf32> to vector<8x128xf32>
    %142 = vector.shape_cast %139 : vector<8x128xf32> to vector<1x8x128xf32>
    tpu.vector_store %arg7[%c0_52, %c0_53, %c0_54], %142 {strides = array<i32>} : memref<2x8x128xf32, #tpu.memory_space<vmem>>, vector<1x8x128xf32>,
    %143 = vector.extract_strided_slice %117 {offsets = [1, 0, 0], sizes = [1, 8, 128], strides = [1, 1, 1]} : vector<2x8x128xf32> to vector<1x8x128xf32>
    %144 = vector.shape_cast %143 : vector<1x8x128xf32> to vector<8x128xf32>
    %cst_55 = arith.constant dense<0.000000e+00> : vector<8x128xf32>
    %145 = tpu.matmul %130, %144, %cst_55 {dimension_numbers = #tpu.dot_dimension_numbers<[1], [0], [0], [1], [0, 0, 1, 1], [], []>} : vector<8x8xf32>, vector<8x128xf32>, vector<8x128xf32> -> vector<8x128xf32>
    %c1_56 = arith.constant 1 : index
    %c0_57 = arith.constant 0 : index
    %c0_58 = arith.constant 0 : index
    %146 = vector.load %arg6[%c1_56, %c0_57, %c0_58] : memref<2x8x128xf32, #tpu.memory_space<vmem>>, vector<1x8x128xf32>
    %147 = vector.shape_cast %146 : vector<1x8x128xf32> to vector<8x128xf32>
    %148 = vector.shape_cast %145 : vector<8x128xf32> to vector<1x8x128xf32>
    tpu.vector_store %arg6[%c1_56, %c0_57, %c0_58], %148 {strides = array<i32>} : memref<2x8x128xf32, #tpu.memory_space<vmem>>, vector<1x8x128xf32>,
    %149 = vector.extract_strided_slice %129 {offsets = [1, 0, 0], sizes = [1, 8, 128], strides = [1, 1, 1]} : vector<2x8x128xf32> to vector<1x8x128xf32>
    %150 = vector.shape_cast %149 : vector<1x8x128xf32> to vector<8x128xf32>
    %cst_59 = arith.constant dense<0.000000e+00> : vector<8x128xf32>
    %151 = tpu.matmul %130, %150, %cst_59 {dimension_numbers = #tpu.dot_dimension_numbers<[1], [0], [0], [1], [0, 0, 1, 1], [], []>} : vector<8x8xf32>, vector<8x128xf32>, vector<8x128xf32> -> vector<8x128xf32>
    %c1_60 = arith.constant 1 : index
    %c0_61 = arith.constant 0 : index
    %c0_62 = arith.constant 0 : index
    %152 = vector.load %arg7[%c1_60, %c0_61, %c0_62] : memref<2x8x128xf32, #tpu.memory_space<vmem>>, vector<1x8x128xf32>
    %153 = vector.shape_cast %152 : vector<1x8x128xf32> to vector<8x128xf32>
    %154 = vector.shape_cast %151 : vector<8x128xf32> to vector<1x8x128xf32>
    tpu.vector_store %arg7[%c1_60, %c0_61, %c0_62], %154 {strides = array<i32>} : memref<2x8x128xf32, #tpu.memory_space<vmem>>, vector<1x8x128xf32>,
    return
  }
  func.func @transform_0(%arg0: i32) -> (i32, i32, i32) {
    %c0_i32 = arith.constant 0 : i32
    %c0_i32_0 = arith.constant 0 : i32
    %c0_i32_1 = arith.constant 0 : i32
    return %c0_i32, %c0_i32_0, %arg0 : i32, i32, i32
  }
  func.func @transform_1(%arg0: i32) -> (i32, i32, i32) {
    %c0_i32 = arith.constant 0 : i32
    %c0_i32_0 = arith.constant 0 : i32
    %c0_i32_1 = arith.constant 0 : i32
    return %c0_i32, %c0_i32_0, %arg0 : i32, i32, i32
  }
  func.func @transform_2(%arg0: i32) -> (i32, i32, i32) {
    %c0_i32 = arith.constant 0 : i32
    %c0_i32_0 = arith.constant 0 : i32
    %c0_i32_1 = arith.constant 0 : i32
    return %c0_i32, %c0_i32_0, %arg0 : i32, i32, i32
  }
  func.func @transform_3(%arg0: i32) -> (i32, i32, i32) {
    %c0_i32 = arith.constant 0 : i32
    %c0_i32_0 = arith.constant 0 : i32
    %c0_i32_1 = arith.constant 0 : i32
    return %c0_i32, %c0_i32_0, %arg0 : i32, i32, i32
  }
  func.func @transform_4(%arg0: i32) -> (i32, i32) {
    %c0_i32 = arith.constant 0 : i32
    %c0_i32_0 = arith.constant 0 : i32
    %c0_i32_1 = arith.constant 0 : i32
    return %c0_i32, %c0_i32_0 : i32, i32
  }
  func.func @transform_5(%arg0: i32) -> (i32, i32, i32) {
    %c0_i32 = arith.constant 0 : i32
    %c0_i32_0 = arith.constant 0 : i32
    %c0_i32_1 = arith.constant 0 : i32
    return %c0_i32, %c0_i32_0, %arg0 : i32, i32, i32
  }
  func.func @transform_6(%arg0: i32) -> (i32, i32, i32) {
    %c0_i32 = arith.constant 0 : i32
    %c0_i32_0 = arith.constant 0 : i32
    %c0_i32_1 = arith.constant 0 : i32
    return %c0_i32, %c0_i32_0, %arg0 : i32, i32, i32
  }
}

</mosaic_0001>

<bundles_post_ra>
// kernel: reverse.0
= control target key start
LH: loop header
LB: loop body
LE: loop exit
PB: predicated region body
PF: predicated region fallthrough
CT: control target
= control target key end

     0   :  { %v71_v3 = vlaneseq  ;;  %v64_v9 = vld [vmem:[#allocation0 + $0x7] ss:$-1 sm:$0xff]  ;;  %v78_v12 = vld [vmem:[#allocation0 + $0x17] ss:$-1 sm:$0xff]  ;;  %s329_s0 = inlined_call_operand.vmem [shape: f32[2,4,16,7], index: 0, kind: input, shape index: {}]   ;;  %s330_s1 = inlined_call_operand.vmem [shape: f32[2,4,16,7], index: 1, kind: output, shape index: {}]  }
   0x1   :  { %v44_v0 = vld [vmem:[%s329_s0] sm:$0xff]  ;;  %v46_v1 = vld [vmem:[%s329_s0 + $0x8] sm:$0xff]  ;;  %v48_v2 = vld [vmem:[%s329_s0 + $0x10] sm:$0xff]  ;;  %v65_v10 = vrot.slane %v64_v9, 1  ;;  %v79_v14 = vrot.slane %v78_v12, 1 }
   0x2   :  { %45 = vst [vmem:[#allocation0 + $0x8] sm:$0xff] %v44_v0  ;;  %47 = vst [vmem:[#allocation0 + $0x18] sm:$0xff] %v46_v1  ;;  %v50_v4 = vld [vmem:[%s329_s0 + $0x18] sm:$0xff]  ;;  %v52_v5 = vld [vmem:[%s329_s0 + $0x20] sm:$0xff]  ;;  %v72_v11 = vshrl.u32 %v71_v3, 7 }
   0x3   :  { %49 = vst [vmem:[#allocation0 + $0x28] sm:$0xff] %v48_v2  ;;  %v54_v6 = vld [vmem:[%s329_s0 + $0x28] sm:$0xff]  ;;  %51 = vst [vmem:[#allocation0 + $0x38] sm:$0xff] %v50_v4  ;;  %v56_v7 = vld [vmem:[%s329_s0 + $0x30] sm:$0xff] }
   0x4   :  { %53 = vst [vmem:[#allocation0 + $0x48] sm:$0xff] %v52_v5  ;;  %55 = vst [vmem:[#allocation0 + $0x58] sm:$0xff] %v54_v6  ;;  %v58_v8 = vld [vmem:[%s329_s0 + $0x38] sm:$0xff]  ;;  %v92_v13 = vld [vmem:[#allocation0 + $0x27] ss:$-1 sm:$0xff]  ;;  %vm73_vm0 = vcmp.lt.s32.totalorder %v72_v11, 7 }
   0x5   :  { %57 = vst [vmem:[#allocation0 + $0x68] sm:$0xff] %v56_v7  ;;  %59 = vst [vmem:[#allocation0 + $0x78] sm:$0xff] %v58_v8  ;;  %v93_v15 = vrot.slane %v92_v13, 1  ;;  %v106_v16 = vld [vmem:[#allocation0 + $0x37] ss:$-1 sm:$0xff] }
   0x6   :  { %66 = vst [vmem:[#allocation1] sm:$0xff] %v65_v10  ;;  %v107_v17 = vrot.slane %v106_v16, 1  ;;  %v120_v18 = vld [vmem:[#allocation0 + $0x47] ss:$-1 sm:$0xff]  ;;  %v134_v19 = vld [vmem:[#allocation0 + $0x57] ss:$-1 sm:$0xff] }
   0x7   :  { %80 = vst [vmem:[#allocation1 + $0x8] sm:$0xff] %v79_v14  ;;  %94 = vst [vmem:[#allocation1 + $0x10] sm:$0xff] %v93_v15  ;;  %v121_v20 = vrot.slane %v120_v18, 1  ;;  %v135_v21 = vrot.slane %v134_v19, 1  ;;  %v148_v22 = vld [vmem:[#allocation0 + $0x67] ss:$-1 sm:$0xff] }
   0x8   :  { %v162_v23 = vld [vmem:[#allocation0 + $0x77] ss:$-1 sm:$0xff]  ;;  %108 = vst [vmem:[#allocation1 + $0x18] sm:$0xff] %v107_v17  ;;  %v149_v24 = vrot.slane %v148_v22, 1 }
   0x9   :  { %v163_v25 = vrot.slane %v162_v23, 1  ;;  %v69_v26 = vld [vmem:[#allocation0 + $0xf] ss:$-1 sm:$0xff]  ;;  %v83_v27 = vld [vmem:[#allocation0 + $0x1f] ss:$-1 sm:$0xff]  ;;  %122 = vst [vmem:[#allocation1 + $0x20] sm:$0xff] %v121_v20 }
   0xa   :  { %v97_v28 = vld [vmem:[#allocation0 + $0x2f] ss:$-1 sm:$0xff]  ;;  %136 = vst [vmem:[#allocation1 + $0x28] sm:$0xff] %v135_v21  ;;  %v70_v29 = vrot.slane %v69_v26, 1  ;;  %v84_v30 = vrot.slane %v83_v27, 1  ;;  %150 = vst [vmem:[#allocation1 + $0x30] sm:$0xff] %v149_v24 }
   0xb   :  { %v98_v31 = vrot.slane %v97_v28, 1  ;;  %v111_v32 = vld [vmem:[#allocation0 + $0x3f] ss:$-1 sm:$0xff]  ;;  %164 = vst [vmem:[#allocation1 + $0x38] sm:$0xff] %v163_v25  ;;  %v125_v34 = vld [vmem:[#allocation0 + $0x4f] ss:$-1 sm:$0xff] }
   0xc   :  { %v112_v33 = vrot.slane %v111_v32, 1  ;;  %v139_v35 = vld [vmem:[#allocation0 + $0x5f] ss:$-1 sm:$0xff]  ;;  %74 = vst.msk [vmem:[#allocation1] sm:$0xff] %vm73_vm0, %v70_v29  ;;  %88 = vst.msk [vmem:[#allocation1 + $0x8] sm:$0xff] %vm73_vm0, %v84_v30  ;;  %v126_v36 = vrot.slane %v125_v34, 1 }
   0xd   :  { %102 = vst.msk [vmem:[#allocation1 + $0x10] sm:$0xff] %vm73_vm0, %v98_v31  ;;  %v140_v37 = vrot.slane %v139_v35, 1  ;;  %v153_v38 = vld [vmem:[#allocation0 + $0x6f] ss:$-1 sm:$0xff]  ;;  %v167_v39 = vld [vmem:[#allocation0 + $0x7f] ss:$-1 sm:$0xff] }
   0xe   :  { %116 = vst.msk [vmem:[#allocation1 + $0x18] sm:$0xff] %vm73_vm0, %v112_v33  ;;  %v154_v40 = vrot.slane %v153_v38, 1  ;;  %v168_v41 = vrot.slane %v167_v39, 1  ;;  %130 = vst.msk [vmem:[#allocation1 + $0x20] sm:$0xff] %vm73_vm0, %v126_v36 }
   0xf   :  { %144 = vst.msk [vmem:[#allocation1 + $0x28] sm:$0xff] %vm73_vm0, %v140_v37 }
  0x10   :  { %158 = vst.msk [vmem:[#allocation1 + $0x30] sm:$0xff] %vm73_vm0, %v154_v40  ;;  %172 = vst.msk [vmem:[#allocation1 + $0x38] sm:$0xff] %vm73_vm0, %v168_v41 }
  0x13   :  { %v214_v42 = vld [vmem:[#allocation1] sm:$0xff]  ;;  %v216_v43 = vld [vmem:[#allocation1 + $0x8] sm:$0xff] }
  0x14   :  { %v218_v44 = vld [vmem:[#allocation1 + $0x10] sm:$0xff]  ;;  %215 = vst [vmem:[%s330_s1] sm:$0xff] %v214_v42  ;;  %217 = vst [vmem:[%s330_s1 + $0x8] sm:$0xff] %v216_v43 }
  0x15   :  { %219 = vst [vmem:[%s330_s1 + $0x10] sm:$0xff] %v218_v44  ;;  %v220_v45 = vld [vmem:[#allocation1 + $0x18] sm:$0xff]  ;;  %v222_v46 = vld [vmem:[#allocation1 + $0x20] sm:$0xff] }
  0x16   :  { %221 = vst [vmem:[%s330_s1 + $0x18] sm:$0xff] %v220_v45  ;;  %v224_v47 = vld [vmem:[#allocation1 + $0x28] sm:$0xff]  ;;  %223 = vst [vmem:[%s330_s1 + $0x20] sm:$0xff] %v222_v46 }
  0x17   :  { %225 = vst [vmem:[%s330_s1 + $0x28] sm:$0xff] %v224_v47  ;;  %v226_v48 = vld [vmem:[#allocation1 + $0x30] sm:$0xff]  ;;  %v228_v49 = vld [vmem:[#allocation1 + $0x38] sm:$0xff] }
  0x18   :  { %227 = vst [vmem:[%s330_s1 + $0x30] sm:$0xff] %v226_v48  ;;  %229 = vst [vmem:[%s330_s1 + $0x38] sm:$0xff] %v228_v49 }

// kernel: spectral_conv_nd_forward.1
= control target key start
LH: loop header
LB: loop body
LE: loop exit
PB: predicated region body
PF: predicated region fallthrough
CT: control target
= control target key end

     0   :  { %v38_v0 = vlaneseq  ;;  %v734_v1 = vmov 0.0   ;;  %v735_v3 = vmov 1966171168   ;;  %vm736_vm0 = vmmov 0   ;;  %s903_s0 = inlined_call_operand.vmem [shape: f32[4,2,128], index: 0, kind: input, shape index: {}]   ;;  %s904_s1 = inlined_call_operand.vmem [shape: f32[4,2,128], index: 1, kind: input, shape index: {}]   ;;  %s905_s2 = inlined_call_operand.vmem [shape: f32[4,8,128], index: 2, kind: input, shape index: {}]   ;;  %s906_s3 = inlined_call_operand.vmem [shape: f32[4,8,128], index: 3, kind: input, shape index: {}]   ;;  %s907_s4 = inlined_call_operand.vmem [shape: f32[8,8], index: 4, kind: input, shape index: {}]   ;;  %s908_s5 = inlined_call_operand.vmem [shape: f32[2,8,128], index: 5, kind: output, shape index: {0}]   ;;  %s909_s6 = inlined_call_operand.vmem [shape: f32[2,8,128], index: 6, kind: output, shape index: {1}]  }
   0x1   :  { %711 = vmatprep.subr.mxu0 %v734_v1  ;;  %716 = vmatprep.subr.mxu1 %v734_v1  ;;  %v677_v2 = vld.sshfl [vmem:[%s903_s0] sm:$0x11 pattern:$0x75316420]  ;;  %v36_v4 = vunpack.c.l.s4 %v735_v3  ;;  %v808_v28 = vld [vmem:[%s905_s2 + $0x8] sm:$0xff]  ;;  %v836_v44 = vld [vmem:[%s905_s2 + $0x10] sm:$0xff] }
   0x2   :  { %v678_v5 = vld.sshfl [vmem:[%s904_s1] sm:$0x11 pattern:$0x75316420]  ;;  %v39_v6 = vshrl.u32 %v38_v0, 7  ;;  %713 = vmatprep.mubr.msk.f32.mxu0 %vm736_vm0, %v734_v1  ;;  %718 = vmatprep.mubr.msk.f32.mxu1 %vm736_vm0, %v734_v1  ;;  %v34_v7 = vcombine.high %v677_v2, %v677_v2  ;;  %v826_v39 = vld [vmem:[%s906_s3 + $0x8] sm:$0xff] }
   0x3   :  { %v37_v8 = vunpack.c.0.s8 %v36_v4  ;;  %v71_v9 = vcombine.high %v678_v5, %v678_v5  ;;  %v683_v10 = vld.sshfl [vmem:[%s903_s0 + $0x2] sm:$0x11 pattern:$0x75316420]  ;;  %v688_v60 = vld [vmem:[%s906_s3 + $0x10] sm:$0xff]  ;;  %v849_v61 = vld [vmem:[%s905_s2 + $0x18] sm:$0xff] }
   0x4   :  { %v787_v12 = vsub.s32 0, %v39_v6  ;;  %v684_v13 = vld.sshfl [vmem:[%s904_s1 + $0x2] sm:$0x11 pattern:$0x75316420]  ;;  %v124_v14 = vcombine.high %v683_v10, %v683_v10  ;;  %vm379_vm1 = vcmask 64512  }
   0x5   :  { %v40_v11 = vsub.s32 %v37_v8, %v39_v6  ;;  %v161_v15 = vcombine.high %v684_v13, %v684_v13  ;;  %v689_v20 = vld.sshfl [vmem:[%s903_s0 + $0x4] sm:$0x11 pattern:$0x75316420]  ;;  %v694_v6 = vld [vmem:[%s906_s3 + $0x18] sm:$0xff] }
   0x6   :  { %v798_v21 = vld [vmem:[%s905_s2] sm:$0xff]  ;;  %v214_v25 = vcombine.high %v689_v20, %v689_v20 }
   0x7   :  { %v41_v16 = vrot.slane %v677_v2, %v40_v11  ;;  %v48_v17 = vrot.slane %v34_v7, %v40_v11  ;;  %v78_v18 = vrot.slane %v678_v5, %v40_v11  ;;  %v85_v19 = vrot.slane %v71_v9, %v40_v11  ;;  %v25_v22 = vld [vmem:[%s906_s3] sm:$0xff] }
   0x8   :  { %v131_v23 = vrot.slane %v683_v10, %v40_v11  ;;  %v168_v24 = vrot.slane %v684_v13, %v40_v11  ;;  %v138_v29 = vrot.slane %v124_v14, %v40_v11  ;;  %v690_v30 = vld.sshfl [vmem:[%s904_s1 + $0x4] sm:$0x11 pattern:$0x75316420]  ;;  %v221_v34 = vrot.slane %v689_v20, %v40_v11 }
   0x9   :  { %v52_v26 = vrot.slane %v41_v16, %v787_v12  ;;  %v89_v27 = vrot.slane %v78_v18, %v787_v12  ;;  %v814_v31 = vrot.slane %v85_v19, %v787_v12  ;;  %v695_v35 = vld.sshfl [vmem:[%s903_s0 + $0x6] sm:$0x11 pattern:$0x75316420]  ;;  %v56_v36 = vrot.slane %v48_v17, %v787_v12 }
   0xa   :  { %v142_v32 = vrot.slane %v131_v23, %v787_v12  ;;  %v179_v33 = vrot.slane %v168_v24, %v787_v12  ;;  %v175_v40 = vrot.slane %v161_v15, %v40_v11  ;;  %v696_v41 = vld.sshfl [vmem:[%s904_s1 + $0x6] sm:$0x11 pattern:$0x75316420]  ;;  %v228_v45 = vrot.slane %v214_v25, %v40_v11 }
   0xb   :  { %v59_v37 = vmul.f32 %v52_v26, %v798_v21  ;;  %v96_v38 = vmul.f32 %v89_v27, %v25_v22  ;;  %v232_v46 = vrot.slane %v221_v34, %v787_v12  ;;  %v251_v48 = vcombine.high %v690_v30, %v690_v30 }
   0xc   :  { %v149_v42 = vmul.f32 %v808_v28, %v142_v32  ;;  %v186_v43 = vmul.f32 %v826_v39, %v179_v33  ;;  %v258_v49 = vrot.slane %v690_v30, %v40_v11  ;;  %v311_v50 = vrot.slane %v695_v35, %v40_v11 }
   0xd   :  { %v98_v47 = vsub.f32 %v59_v37, %v96_v38  ;;  %v97_v51 = vmul.f32 %v814_v31, %v25_v22  ;;  %v304_v52 = vcombine.high %v695_v35, %v695_v35  ;;  %v341_v53 = vcombine.high %v696_v41, %v696_v41 }
   0xe   :  { %v348_v54 = vrot.slane %v696_v41, %v40_v11  ;;  %v239_v56 = vmul.f32 %v836_v44, %v232_v46  ;;  %v269_v57 = vrot.slane %v258_v49, %v787_v12  ;;  %v322_v58 = vrot.slane %v311_v50, %v787_v12  ;;  %v378_v41 = vld [vmem:[%s907_s4] sm:$0xff] }
   0xf   :  { %v151_v55 = vadd.f32 %v149_v42, %v98_v47  ;;  %v101_v59 = vmul.f32 %v56_v36, %v25_v22  ;;  %v100_v63 = vmul.f32 %v52_v26, %v25_v22  ;;  %v104_v0 = vmul.f32 %v89_v27, %v798_v21 }
  0x10   :  { %v359_v62 = vrot.slane %v348_v54, %v787_v12  ;;  %v265_v3 = vrot.slane %v251_v48, %v40_v11  ;;  %v276_v4 = vmul.f32 %v688_v60, %v269_v57  ;;  %v190_v5 = vmul.f32 %v826_v39, %v142_v32 }
  0x11   :  { %v188_v2 = vsub.f32 %v151_v55, %v186_v43  ;;  %v318_v7 = vrot.slane %v304_v52, %v40_v11  ;;  %v355_v8 = vrot.slane %v341_v53, %v40_v11  ;;  %v106_v9 = vadd.f32 %v104_v0, %v100_v63 }
  0x12   :  { %v194_v10 = vmul.f32 %v808_v28, %v179_v33  ;;  %v329_v14 = vmul.f32 %v849_v61, %v322_v58  ;;  %v366_v15 = vmul.f32 %v694_v6, %v359_v62  ;;  %v280_v16 = vmul.f32 %v688_v60, %v232_v46 }
  0x13   :  { %v241_v13 = vadd.f32 %v239_v56, %v188_v2  ;;  %v192_v17 = vadd.f32 %v190_v5, %v106_v9  ;;  %v60_v18 = vmul.f32 %v56_v36, %v798_v21  ;;  %v146_v19 = vrot.slane %v138_v29, %v787_v12 }
  0x14   :  { %v183_v20 = vrot.slane %v175_v40, %v787_v12  ;;  %v284_v23 = vmul.f32 %v836_v44, %v269_v57  ;;  %v236_v11 = vrot.slane %v228_v45, %v787_v12  ;;  %v273_v24 = vrot.slane %v265_v3, %v787_v12 }
  0x15   :  { %v278_v22 = vsub.f32 %v241_v13, %v276_v4  ;;  %v196_v25 = vadd.f32 %v194_v10, %v192_v17  ;;  %v99_v26 = vsub.f32 %v60_v18, %v97_v51  ;;  %v150_v27 = vmul.f32 %v808_v28, %v146_v19 }
  0x16   :  { %v187_v30 = vmul.f32 %v826_v39, %v183_v20  ;;  %v370_v33 = vmul.f32 %v694_v6, %v322_v58  ;;  %v374_v34 = vmul.f32 %v849_v61, %v359_v62  ;;  %v326_v29 = vrot.slane %v318_v7, %v787_v12 }
  0x17   :  { %v331_v32 = vadd.f32 %v329_v14, %v278_v22  ;;  %v282_v35 = vadd.f32 %v280_v16, %v196_v25  ;;  %v152_v36 = vadd.f32 %v150_v27, %v99_v26  ;;  %v240_v37 = vmul.f32 %v836_v44, %v236_v11 }
  0x18   :  { %v105_v38 = vmul.f32 %v814_v31, %v798_v21  ;;  %v277_v42 = vmul.f32 %v688_v60, %v273_v24  ;;  %v363_v43 = vrot.slane %v355_v8, %v787_v12  ;;  %v191_v45 = vmul.f32 %v826_v39, %v146_v19 }
  0x19   :  { %v368_v40 = vsub.f32 %v331_v32, %v366_v15  ;;  %v286_v46 = vadd.f32 %v284_v23, %v282_v35  ;;  %v189_v47 = vsub.f32 %v152_v36, %v187_v30  ;;  %v195_v49 = vmul.f32 %v808_v28, %v183_v20 }
  0x1a   :  { %v107_v48 = vadd.f32 %v105_v38, %v101_v59  ;;  %v330_v50 = vmul.f32 %v849_v61, %v326_v29  ;;  %v281_v51 = vmul.f32 %v688_v60, %v236_v11  ;;  %v367_v53 = vmul.f32 %v694_v6, %v363_v43 }
  0x1b   :  { %712 = vmatpush3.msra.mxu0 %v368_v40  ;;  %v372_v21 = vadd.f32 %v370_v33, %v286_v46  ;;  %v242_v31 = vadd.f32 %v240_v37, %v189_v47  ;;  %v285_v28 = vmul.f32 %v836_v44, %v273_v24  ;;  %v371_v57 = vmul.f32 %v694_v6, %v326_v29 }
  0x1c   :  { %714 = vmatmul.mubr.msk.f32.vlgmr.msra.gmra.mrb[0].mxu0 %vm379_vm1, %v378_v41  ;;  %721 = vmatprep.subr.mxu0 %v734_v1  ;;  %v193_v52 = vadd.f32 %v191_v45, %v107_v48  ;;  %v375_v60 = vmul.f32 %v849_v61, %v363_v43 }
  0x1d   :  { %723 = vmatprep.mubr.msk.f32.mxu0 %vm736_vm0, %v734_v1  ;;  %v376_v12 = vadd.f32 %v374_v34, %v372_v21  ;;  %v279_v39 = vsub.f32 %v242_v31, %v277_v42 }
  0x1e   :  { %v197_v54 = vadd.f32 %v195_v49, %v193_v52 }
  0x1f   :  { %717 = vmatpush3.msra.mxu1 %v376_v12  ;;  %v332_v55 = vadd.f32 %v330_v50, %v279_v39 }
  0x20   :  { %v283_v56 = vadd.f32 %v281_v51, %v197_v54  ;;  %719 = vmatmul.mubr.msk.f32.vlgmr.msra.gmra.mrb[0].mxu1 %vm379_vm1, %v378_v41  ;;  %726 = vmatprep.subr.mxu1 %v734_v1 }
  0x21   :  { %v369_v58 = vsub.f32 %v332_v55, %v367_v53  ;;  %728 = vmatprep.mubr.msk.f32.mxu1 %vm736_vm0, %v734_v1 }
  0x22   :  { %v287_v59 = vadd.f32 %v285_v28, %v283_v56 }
  0x23   :  { %722 = vmatpush3.msra.mxu0 %v369_v58 }
  0x24   :  { %v373_v62 = vadd.f32 %v371_v57, %v287_v59  ;;  %724 = vmatmul.mubr.msk.f32.vlgmr.msra.gmra.mrb[2].mxu0 %vm379_vm1, %v378_v41 }
  0x26   :  { %v377_v44 = vadd.f32 %v375_v60, %v373_v62 }
  0x28   :  { %727 = vmatpush3.msra.mxu1 %v377_v44 }
  0x29   :  { %729 = vmatmul.mubr.msk.f32.vlgmr.msra.gmra.mrb[2].mxu1 %vm379_vm1, %v378_v41 }
  0xef   :  { %v449_v63 = vpop.f32.mrb[0].mxu0 }
  0xf0   :  { %453 = vst [vmem:[%s908_s5] sm:$0xff] %v449_v63  ;;  %v715_v0 = vpop.f32.mrb[1].mxu0 }
  0xf3   :  { %v520_v2 = vpop.f32.mrb[0].mxu1 }
  0xf4   :  { %524 = vst [vmem:[%s909_s6] sm:$0xff] %v520_v2  ;;  %v720_v1 = vpop.f32.mrb[1].mxu1 }
  0xf7   :  { %v591_v61 = vpop.f32.mrb[2].mxu0 }
  0xf8   :  { %700 = vst [vmem:[%s908_s5 + $0x8] sm:$0xff] %v591_v61  ;;  %v725_v3 = vpop.f32.mrb[3].mxu0 }
  0xfc   :  { %v663_v4 = vpop.f32.mrb[2].mxu1 }
  0xfd   :  { %702 = vst [vmem:[%s909_s6 + $0x8] sm:$0xff] %v663_v4  ;;  %v730_v5 = vpop.f32.mrb[3].mxu1 }

</bundles_post_ra>
